<compile_context>
chip_gen: v7x
topology: tpu7x:2x2x1
jax: 0.10.0
libtpu: 0.0.40
codegen_flags: <defaults>
</compile_context>

<pallas_src>
import math

import jax
import jax.numpy as jnp
from jax.experimental import pallas as pl
from jax.experimental.pallas import tpu as pltpu


NEG_SLOPE = 0.01
LANE = 128      # vreg lane width
SUBLANE16 = 16  # bf16-friendly sublane multiple for batch tiles


def _leaky_relu(v):
    # max(v, slope*v) == leaky_relu(v) for slope in (0, 1): mul + max (2 VALU ops).
    return jnp.maximum(v, NEG_SLOPE * v)


def _round_up(n, m):
    return ((n + m - 1) // m) * m


def _cdiv(a, b):
    return (a + b - 1) // b


def _tpu_vmem_bytes(default=64 << 20):
    """Physical VMEM capacity; conservative fallback = v7x's 64 MiB."""
    try:
        info = pltpu.get_tpu_info()
        return int(getattr(info, "vmem_capacity_bytes", default))
    except Exception:
        return default


def _auto_batch_tile(B, cap=1024):
    """16-aligned batch tile; aim for >=2 grid steps so the 'parallel' axis can
    shard across both TensorCores on v7x, while keeping tiles large (per-step
    overhead ~0.35us)."""
    B_al = _round_up(max(int(B), 1), SUBLANE16)
    if B_al >= 2 * SUBLANE16:
        tile = _round_up(_cdiv(B_al, 2), SUBLANE16)
    else:
        tile = B_al
    return int(max(SUBLANE16, min(int(cap), tile)))


# --------------------------------------------------------------------------- #
# Kernel
# --------------------------------------------------------------------------- #
def ginn_kernel(x_ref, w1_ref, b1_ref, w2_ref, b2_ref, o_ref):
    # Layer 1: bf16 operands on the MXU, f32 accumulation; bias + LeakyReLU in f32.
    x = x_ref[...].astype(w1_ref.dtype)
    h = jnp.dot(x, w1_ref[...], preferred_element_type=jnp.float32)
    h = _leaky_relu(h + b1_ref[...])
    # Layer 2.
    y = jnp.dot(h.astype(w2_ref.dtype), w2_ref[...],
                preferred_element_type=jnp.float32)
    y = _leaky_relu(y + b2_ref[...])
    o_ref[...] = y.astype(o_ref.dtype)


# --------------------------------------------------------------------------- #
# One-time parameter preparation (amortized across calls)
# --------------------------------------------------------------------------- #
def prepare_ginn_params(w1_t, b1, w2_t, b2):
    """Pad + cast parameters once.

    Only the hidden dim H1 is padded to a lane multiple (zero rows/cols and
    zero bias -> LeakyReLU(0)=0 -> exact). The contraction dim D and the output
    dim H2 stay at their native sizes so x and the output need no padding.
    """
    D, H1 = w1_t.shape
    H1b, H2 = w2_t.shape
    assert H1b == H1
    H1_p = _round_up(H1, LANE)

    bf16 = jnp.bfloat16
    w1p = jnp.zeros((D, H1_p), bf16).at[:, :H1].set(w1_t.astype(bf16))
    b1p = jnp.zeros((1, H1_p), jnp.float32).at[:, :H1].set(
        jnp.reshape(b1, (1, H1)).astype(jnp.float32))
    w2p = jnp.zeros((H1_p, H2), bf16).at[:H1, :].set(w2_t.astype(bf16))
    b2p = jnp.reshape(b2, (1, H2)).astype(jnp.float32)
    return w1p, b1p, w2p, b2p


# --------------------------------------------------------------------------- #
# Forward wrapper
# --------------------------------------------------------------------------- #
def ginn_forward(x, prepared, *, batch_tile=None):
    """Fused GINN forward.

    x: [B, D] (f32); prepared = prepare_ginn_params(...). Returns [B, H2] in x.dtype.
    """
    w1p, b1p, w2p, b2p = prepared
    B, D = x.shape
    assert w1p.shape[0] == D, (w1p.shape, D)
    H1_p = w1p.shape[1]
    H2 = w2p.shape[1]

    if batch_tile is None:
        tile = _auto_batch_tile(B)
    else:
        tile = max(SUBLANE16, _round_up(int(batch_tile), SUBLANE16))

    B_p = _round_up(B, tile)
    xp = x if B_p == B else jnp.pad(x, ((0, B_p - B), (0, 0)))
    grid = (B_p // tile,)

    # ---- generation-aware VMEM budget (actual tile footprint + headroom)
    xb = 4  # f32 input
    est = (2 * tile * D * xb                       # x tiles (double-buffered)
           + 2 * tile * H2 * 4                     # out tiles (double-buffered)
           + 2 * (D * H1_p + H1_p * H2) * 2        # bf16 weights (default 2 bufs)
           + 2 * (H1_p + H2) * 4                   # f32 biases
           + tile * (2 * D + 6 * H1_p + 4 * H2))   # in-kernel temporaries
    vmem_cap = _tpu_vmem_bytes()
    vmem_limit = int(min(max(int(est * 1.5) + (2 << 20), 16 << 20),
                         int(vmem_cap * 0.75)))

    out = pl.pallas_call(
        ginn_kernel,
        out_shape=jax.ShapeDtypeStruct((B_p, H2), x.dtype),
        grid_spec=pltpu.PrefetchScalarGridSpec(
            num_scalar_prefetch=0,
            grid=grid,
            in_specs=[
                pl.BlockSpec((tile, D), lambda i: (i, 0)),    # x tile (unpadded D)
                pl.BlockSpec((D, H1_p), lambda i: (0, 0)),    # W1^T (resident)
                pl.BlockSpec((1, H1_p), lambda i: (0, 0)),    # b1
                pl.BlockSpec((H1_p, H2), lambda i: (0, 0)),   # W2^T (resident)
                pl.BlockSpec((1, H2), lambda i: (0, 0)),      # b2
            ],
            out_specs=pl.BlockSpec((tile, H2), lambda i: (i, 0)),
        ),
        compiler_params=pltpu.CompilerParams(
            dimension_semantics=("parallel",),
            vmem_limit_bytes=vmem_limit),
    )(xp, w1p, b1p, w2p, b2p)

    return out if B_p == B else out[:B]


# --------------------------------------------------------------------------- #
# Init mirroring the PyTorch GINN.__init__
# --------------------------------------------------------------------------- #
def init_ginn_params(key, input_ch):
    """l1: Linear(input_ch, input_ch//2), l2: Linear(input_ch//2, input_ch//4);
    weights xavier_uniform(gain=calculate_gain('leaky_relu')), biases PyTorch
    Linear default U(-1/sqrt(fan_in), 1/sqrt(fan_in))."""
    h1 = int(input_ch / 2)
    h2 = int(h1 / 2)
    gain = math.sqrt(2.0 / (1.0 + NEG_SLOPE ** 2))

    k1, k2, k3, k4 = jax.random.split(key, 4)

    def xavier_uniform(k, fan_out, fan_in):
        bound = gain * math.sqrt(6.0 / (fan_in + fan_out))
        w = jax.random.uniform(k, (fan_out, fan_in), jnp.float32, -bound, bound)
        return w.T  # store transposed: [in, out]

    def bias_uniform(k, fan_in, fan_out):
        bound = 1.0 / math.sqrt(fan_in)
        return jax.random.uniform(k, (1, fan_out), jnp.float32, -bound, bound)

    w1_t = xavier_uniform(k1, h1, input_ch)   # [input_ch, h1]
    b1 = bias_uniform(k2, input_ch, h1)       # [1, h1]
    w2_t = xavier_uniform(k3, h2, h1)         # [h1, h2]
    b2 = bias_uniform(k4, h1, h2)             # [1, h2]
    return w1_t, b1, w2_t, b2


def ginn_reference(x, w1_t, b1, w2_t, b2):
    h = jnp.where(x @ w1_t + b1 > 0, x @ w1_t + b1, NEG_SLOPE * (x @ w1_t + b1))
    y = h @ w2_t + b2
    return jnp.where(y > 0, y, NEG_SLOPE * y)


if __name__ == "__main__":
    key = jax.random.PRNGKey(0)
    kx, kp = jax.random.split(key)

    batch = 64
    input_ch = 32  # -> hidden 16 -> output 8

    x = jax.random.normal(kx, (batch, input_ch), dtype=jnp.float32)
    w1_t, b1, w2_t, b2 = init_ginn_params(kp, input_ch)
    prepared = prepare_ginn_params(w1_t, b1, w2_t, b2)   # one-time pad/cast

    ref = ginn_reference(x, w1_t, b1, w2_t, b2)
    tol = dict(atol=3e-2, rtol=3e-2)  # bf16 matmul operands, f32 accumulation

    # Auto tile: >= 2 parallel grid steps (uses both v7x TensorCores).
    out = jax.block_until_ready(ginn_forward(x, prepared))
    assert out.shape == (batch, input_ch // 4), out.shape
    assert jnp.allclose(out, ref, **tol), "mismatch vs reference (auto tile)"

    # Smaller explicit tile: 4-step pipelined grid.
    out2 = jax.block_until_ready(ginn_forward(x, prepared, batch_tile=16))
    assert out2.shape == (batch, input_ch // 4), out2.shape
    assert jnp.allclose(out2, ref, **tol), "mismatch vs reference (tile=16)"

    # Ragged batch: exercises the row-pad + row-slice path.
    xr = x[:50]
    out3 = jax.block_until_ready(ginn_forward(xr, prepared))
    assert out3.shape == (50, input_ch // 4), out3.shape
    assert jnp.allclose(out3, ginn_reference(xr, w1_t, b1, w2_t, b2), **tol), \
        "mismatch vs reference (ragged batch)"

    print("KERNEL_OK")
</pallas_src>

<mosaic_0001>
module attributes {stable_mosaic.version = 11 : i64} {
  func.func @ginn_kernel(%arg0: i32, %arg1: memref<32x32xf32, #tpu.memory_space<vmem>>, %arg2: memref<32x128xbf16, #tpu.memory_space<vmem>>, %arg3: memref<1x128xf32, #tpu.memory_space<vmem>>, %arg4: memref<128x8xbf16, #tpu.memory_space<vmem>>, %arg5: memref<1x8xf32, #tpu.memory_space<vmem>>, %arg6: memref<32x8xf32, #tpu.memory_space<vmem>>) attributes {dimension_semantics = [#tpu.dimension_semantics<parallel>], iteration_bounds = array<i64: 2>, scalar_prefetch = 0 : i64, scratch_operands = 0 : i64, tpu.core_type = #tpu.core_type<tc>, window_params = [{transform_indices = @transform_0, window_bounds = array<i64: 32, 32>}, {pipeline_mode = #tpu.pipeline_mode<synchronous>, transform_indices = @transform_1, window_bounds = array<i64: 32, 128>}, {pipeline_mode = #tpu.pipeline_mode<synchronous>, transform_indices = @transform_2, window_bounds = array<i64: 1, 128>}, {pipeline_mode = #tpu.pipeline_mode<synchronous>, transform_indices = @transform_3, window_bounds = array<i64: 128, 8>}, {pipeline_mode = #tpu.pipeline_mode<synchronous>, transform_indices = @transform_4, window_bounds = array<i64: 1, 8>}, {transform_indices = @transform_5, window_bounds = array<i64: 32, 8>}]} {
    %c0 = arith.constant 0 : index
    %c0_0 = arith.constant 0 : index
    %0 = vector.load %arg1[%c0, %c0_0] : memref<32x32xf32, #tpu.memory_space<vmem>>, vector<32x32xf32>
    %1 = arith.truncf %0 : vector<32x32xf32> to vector<32x32xbf16>
    %c0_1 = arith.constant 0 : index
    %c0_2 = arith.constant 0 : index
    %2 = vector.load %arg2[%c0_1, %c0_2] : memref<32x128xbf16, #tpu.memory_space<vmem>>, vector<32x128xbf16>
    %cst = arith.constant dense<0.000000e+00> : vector<32x128xf32>
    %3 = tpu.matmul %1, %2, %cst {dimension_numbers = #tpu.dot_dimension_numbers<[1], [0], [0], [1], [0, 0, 1, 1], [], []>} : vector<32x32xbf16>, vector<32x128xbf16>, vector<32x128xf32> -> vector<32x128xf32>
    %c0_3 = arith.constant 0 : index
    %c0_4 = arith.constant 0 : index
    %4 = vector.load %arg3[%c0_3, %c0_4] : memref<1x128xf32, #tpu.memory_space<vmem>>, vector<1x128xf32>
    %5 = vector.broadcast %4 : vector<1x128xf32> to vector<32x128xf32>
    %6 = arith.addf %3, %5 : vector<32x128xf32>
    %cst_5 = arith.constant 0.00999999977 : f32
    %7 = vector.broadcast %cst_5 : f32 to vector<32x128xf32>
    %8 = arith.mulf %7, %6 : vector<32x128xf32>
    %9 = arith.maximumf %6, %8 : vector<32x128xf32>
    %10 = arith.truncf %9 : vector<32x128xf32> to vector<32x128xbf16>
    %c0_6 = arith.constant 0 : index
    %c0_7 = arith.constant 0 : index
    %11 = vector.load %arg4[%c0_6, %c0_7] : memref<128x8xbf16, #tpu.memory_space<vmem>>, vector<128x8xbf16>
    %cst_8 = arith.constant dense<0.000000e+00> : vector<32x8xf32>
    %12 = tpu.matmul %10, %11, %cst_8 {dimension_numbers = #tpu.dot_dimension_numbers<[1], [0], [0], [1], [0, 0, 1, 1], [], []>} : vector<32x128xbf16>, vector<128x8xbf16>, vector<32x8xf32> -> vector<32x8xf32>
    %c0_9 = arith.constant 0 : index
    %c0_10 = arith.constant 0 : index
    %13 = vector.load %arg5[%c0_9, %c0_10] : memref<1x8xf32, #tpu.memory_space<vmem>>, vector<1x8xf32>
    %14 = vector.broadcast %13 : vector<1x8xf32> to vector<32x8xf32>
    %15 = arith.addf %12, %14 : vector<32x8xf32>
    %cst_11 = arith.constant 0.00999999977 : f32
    %16 = vector.broadcast %cst_11 : f32 to vector<32x8xf32>
    %17 = arith.mulf %16, %15 : vector<32x8xf32>
    %18 = arith.maximumf %15, %17 : vector<32x8xf32>
    %c0_12 = arith.constant 0 : index
    %c0_13 = arith.constant 0 : index
    %19 = vector.load %arg6[%c0_12, %c0_13] : memref<32x8xf32, #tpu.memory_space<vmem>>, vector<32x8xf32>
    tpu.vector_store %arg6[%c0_12, %c0_13], %18 {strides = array<i32>} : memref<32x8xf32, #tpu.memory_space<vmem>>, vector<32x8xf32>,
    return
  }
  func.func @transform_0(%arg0: i32) -> (i32, i32) {
    %c0_i32 = arith.constant 0 : i32
    %c0_i32_0 = arith.constant 0 : i32
    return %arg0, %c0_i32 : i32, i32
  }
  func.func @transform_1(%arg0: i32) -> (i32, i32) {
    %c0_i32 = arith.constant 0 : i32
    %c0_i32_0 = arith.constant 0 : i32
    %c0_i32_1 = arith.constant 0 : i32
    return %c0_i32, %c0_i32_0 : i32, i32
  }
  func.func @transform_2(%arg0: i32) -> (i32, i32) {
    %c0_i32 = arith.constant 0 : i32
    %c0_i32_0 = arith.constant 0 : i32
    %c0_i32_1 = arith.constant 0 : i32
    return %c0_i32, %c0_i32_0 : i32, i32
  }
  func.func @transform_3(%arg0: i32) -> (i32, i32) {
    %c0_i32 = arith.constant 0 : i32
    %c0_i32_0 = arith.constant 0 : i32
    %c0_i32_1 = arith.constant 0 : i32
    return %c0_i32, %c0_i32_0 : i32, i32
  }
  func.func @transform_4(%arg0: i32) -> (i32, i32) {
    %c0_i32 = arith.constant 0 : i32
    %c0_i32_0 = arith.constant 0 : i32
    %c0_i32_1 = arith.constant 0 : i32
    return %c0_i32, %c0_i32_0 : i32, i32
  }
  func.func @transform_5(%arg0: i32) -> (i32, i32) {
    %c0_i32 = arith.constant 0 : i32
    %c0_i32_0 = arith.constant 0 : i32
    return %arg0, %c0_i32 : i32, i32
  }
}

</mosaic_0001>

<bundles_post_ra>
// kernel: tpu_custom_call.1
= control target key start
LH: loop header
LB: loop body
LE: loop exit
PB: predicated region body
PF: predicated region fallthrough
CT: control target
= control target key end

     0   :  { %s636_s18 = smov 0   ;;  %s696_s0 = inlined_call_operand.vmem [shape: f32[64,32], index: 0, kind: input, shape index: {}]   ;;  %s697_s1 = inlined_call_operand.vmem [shape: bf16[32,128], index: 1, kind: input, shape index: {}]   ;;  %s698_s2 = inlined_call_operand.vmem [shape: f32[1,128], index: 2, kind: input, shape index: {}]   ;;  %s699_s3 = inlined_call_operand.vmem [shape: bf16[128,8], index: 3, kind: input, shape index: {}]   ;;  %s700_s4 = inlined_call_operand.vmem [shape: f32[1,8], index: 4, kind: input, shape index: {}]   ;;  %s701_s5 = inlined_call_operand.vmem [shape: f32[64,8], index: 5, kind: output, shape index: {}]  }
   0x1 LB: > { %s513_s19 = sadd.s32 4294967295, %s604_s18   ;;  %p517_p0 = scmp.ge.s32.totalorder %s604_s18, 1  ;;  %s604_s18 = sphi %s636_s18, %s15_s18  }
   0x2   : > { %p188_p1 = scmp.lt.s32.totalorder %s604_s18, 3 }
   0x4   : > { %p189_p2 = pnand %p517_p0, %p188_p1 }
   0x5   : > { %v588_v0 = vld [vmem:[%s697_s1] sm:$0xff] (!%p189_p2)   ;;  %s518_s22 = sshll.u32 (!%p189_p2), %s513_s19, 2  ;;  %v589_v1 = vld [vmem:[%s697_s1 + $0x8] sm:$0xff] (!%p189_p2)   ;;  %v592_v4 = vld [vmem:[%s699_s3 + $0x10] sm:$0xff] (!%p189_p2)   ;;  %vm258_vm0 = vcmask (!%p189_p2), 261120   ;;  %vm452_vm1 = vcmask (!%p189_p2), 64512  }
   0x6   : > { %192 = sbr.rel (%p189_p2) target bundleno = 466 (0x1d2), region = 40  ;;  %p217_p3 = scmp.lt.s32.totalorder (!%p189_p2), %s518_s22, 7  ;;  %552 = vmatprep.subr.bf16.mxu0 (!%p189_p2), %v588_v0  ;;  %v590_v2 = vld [vmem:[%s699_s3] sm:$0xff] (!%p189_p2)   ;;  %v591_v3 = vld [vmem:[%s699_s3 + $0x8] sm:$0xff] (!%p189_p2)   ;;  %v593_v11 = vld [vmem:[%s699_s3 + $0x18] sm:$0xff] (!%p189_p2)  }
   0x7   : > { %553 = vmatpush3.bf16.msra.mxu0 (!%p189_p2), %v588_v0  ;;  %560 = vmatprep.subr.bf16.mxu1 (!%p189_p2), %v590_v2  ;;  %v594_v12 = vld [vmem:[%s699_s3 + $0x20] sm:$0xff] (!%p189_p2)   ;;  %v595_v13 = vld [vmem:[%s699_s3 + $0x28] sm:$0xff] (!%p189_p2)   ;;  %v596_v14 = vld [vmem:[%s699_s3 + $0x30] sm:$0xff] (!%p189_p2)  }
   0x8   : > { %554 = vmatprep.subr.bf16.mxu0 (!%p189_p2), %v589_v1  ;;  %561 = vmatpush3.bf16.msra.mxu1 (!%p189_p2), %v590_v2  ;;  %v597_v15 = vld [vmem:[%s699_s3 + $0x38] sm:$0xff] (!%p189_p2)   ;;  %v522_v16 = vld [vmem:[%s698_s2] ss:$0 sm:$0xff] (!%p189_p2) }
   0x9   : > { %562 = vmatprep.subr.bf16.mxu1 (!%p189_p2), %v591_v3  ;;  %v527_v35 = vld [vmem:[%s700_s4] ss:$0 sm:$0xff] (!%p189_p2) }
   0xb   : > { %555 = vmatpush3.bf16.msra.mxu0 (!%p189_p2), %v589_v1 }
   0xc   : > { %563 = vmatpush3.bf16.msra.mxu1 (!%p189_p2), %v591_v3 }
   0xd   : > { %s703_s22 = smov (!%p217_p3, %s518_s22), 7  ;;  %564 = vmatprep.subr.bf16.mxu1 %v592_v4 }
   0xe   : > { %s519_s29 = sshll.u32 %s703_s22, 3 }
   0xf   : > { %s220_s7 = scalar_lea.vmem %s696_s0, %s519_s29  ;;  %s226_s28 = scalar_lea.vmem %s701_s5, %s519_s29 }
  0x10   : > { %v229_v5 = vld [vmem:[%s220_s7] sm:$0xff]  ;;  %v230_v6 = vld [vmem:[%s220_s7 + $0x8] sm:$0xff]  ;;  %v231_v7 = vld [vmem:[%s220_s7 + $0x10] sm:$0xff]  ;;  %565 = vmatpush3.bf16.msra.mxu1 %v592_v4 }
  0x11   : > { %v233_v8 = vpack.c.bf16 %v230_v6, %v229_v5  ;;  %v232_v9 = vld [vmem:[%s220_s7 + $0x18] sm:$0xff]  ;;  %566 = vmatprep.subr.bf16.mxu1 %v593_v11 }
  0x12   : > { %v234_v10 = vpack.c.bf16 %v232_v9, %v231_v7 }
  0x13   : > { %556 = vmatprep.mubr.msk.bf16.mxu0 %vm258_vm0, %v233_v8 }
  0x14   : > { %557 = vmatmul.mubr.msk.bf16.vlgmr.msra.gmra.mrb[0].mxu0 %vm258_vm0, %v234_v10  ;;  %567 = vmatpush3.bf16.msra.mxu1 %v593_v11 }
  0x15   : > { %568 = vmatprep.subr.bf16.mxu1 %v594_v12 }
  0x18   : > { %569 = vmatpush3.bf16.msra.mxu1 %v594_v12 }
  0x19   : > { %570 = vmatprep.subr.bf16.mxu1 %v595_v13 }
  0x1c   : > { %571 = vmatpush3.bf16.msra.mxu1 %v595_v13 }
  0x1d   : > { %572 = vmatprep.subr.bf16.mxu1 %v596_v14 }
  0x20   : > { %573 = vmatpush3.bf16.msra.mxu1 %v596_v14 }
  0x21   : > { %574 = vmatprep.subr.bf16.mxu1 %v597_v15 }
  0x24   : > { %575 = vmatpush3.bf16.msra.mxu1 %v597_v15 }
  0xe7   : > { %v558_v17 = vpop.f32.mrb[0].mxu0 }
  0xe8   : > { %v308_v18 = vadd.f32 %v558_v17, %v522_v16  ;;  %v299_v19 = vpop.f32.mrb[1].mxu0 }
  0xe9   : > { %v300_v20 = vadd.f32 %v522_v16, %v299_v19  ;;  %v559_v21 = vpop.f32.mrb[2].mxu0 }
  0xea   : > { %v316_v22 = vmul.f32 0.01, %v308_v18  ;;  %v311_v23 = vadd.f32 %v559_v21, %v522_v16  ;;  %v302_v24 = vpop.f32.mrb[3].mxu0 }
  0xeb   : > { %v314_v25 = vmul.f32 0.01, %v300_v20  ;;  %v303_v26 = vadd.f32 %v522_v16, %v302_v24 }
  0xec   : > { %v317_v27 = vmul.f32 0.01, %v311_v23  ;;  %v320_v29 = vmax.f32 %v308_v18, %v316_v22 }
  0xed   : > { %v315_v28 = vmul.f32 0.01, %v303_v26  ;;  %v318_v31 = vmax.f32 %v300_v20, %v314_v25 }
  0xee   : > { %v321_v30 = vmax.f32 %v311_v23, %v317_v27 }
  0xef   : > { %v319_v32 = vmax.f32 %v303_v26, %v315_v28 }
  0xf0   : > { %v323_v33 = vpack.c.bf16 %v321_v30, %v320_v29 }
  0xf1   : > { %v322_v34 = vpack.c.bf16 %v319_v32, %v318_v31 }
  0xf3   : > { %576 = vmatprep.mubr.bf16.mxu1 %v322_v34 }
  0xf4   : > { %577 = vmatmul.mubr.bf16.vlgmr.msra.gmra.mrb[0].mxu1 %v323_v33 }
 0x1c7   : > { %v578_v36 = vpop.f32.mrb[0].mxu1 }
 0x1c8   : > { %v438_v37 = vadd.f32 %v578_v36, %v527_v35  ;;  %v429_v38 = vpop.f32.mrb[1].mxu1 }
 0x1c9   : > { %v430_v39 = vadd.f32 %v527_v35, %v429_v38  ;;  %v579_v40 = vpop.f32.mrb[2].mxu1 }
 0x1ca   : > { %v441_v41 = vadd.f32 %v579_v40, %v527_v35  ;;  %v432_v42 = vpop.f32.mrb[3].mxu1  ;;  %v446_v45 = vmul.f32 0.01, %v438_v37 }
 0x1cb   : > { %v444_v43 = vmul.f32 0.01, %v430_v39  ;;  %v433_v44 = vadd.f32 %v527_v35, %v432_v42 }
 0x1cc   : > { %v447_v47 = vmul.f32 0.01, %v441_v41  ;;  %v450_v50 = vmax.f32 %v438_v37, %v446_v45 }
 0x1cd   : > { %v448_v46 = vmax.f32 %v430_v39, %v444_v43  ;;  %v445_v48 = vmul.f32 0.01, %v433_v44 }
 0x1ce   : > { %v451_v51 = vmax.f32 %v441_v41, %v447_v47  ;;  %455 = vst.msk [vmem:[%s226_s28 + $0x10] sm:$0xff] %vm452_vm1, %v450_v50 }
 0x1cf   : > { %453 = vst.msk [vmem:[%s226_s28] sm:$0xff] %vm452_vm1, %v448_v46  ;;  %v449_v49 = vmax.f32 %v433_v44, %v445_v48 }
 0x1d0   : > { %456 = vst.msk [vmem:[%s226_s28 + $0x18] sm:$0xff] %vm452_vm1, %v451_v51 }
 0x1d1   : > { %454 = vst.msk [vmem:[%s226_s28 + $0x8] sm:$0xff] %vm452_vm1, %v449_v49 }
 0x1d2 PF: > { %s15_s18 = sadd.s32 1, %s604_s18  }
 0x1d3   : > { %p12_p4 = scmp.ge.s32.totalorder %s15_s18, 4  }
 0x1d5   :  { %14 = sbr.rel (!%p12_p4) target bundleno = 1 (0x1), region = 70 }

</bundles_post_ra>
